<compile_context>
chip_gen: v5e
topology: v5e:2x2
jax: 0.10.0
libtpu: 0.0.40
codegen_flags: <defaults>
</compile_context>

<pallas_src>
import functools

import jax
import jax.numpy as jnp
from jax import lax
from jax.experimental import pallas as pl
from jax.experimental.pallas import tpu as pltpu


def _fused_conv_relu_bn_kernel(eps, inv_m, w_ref, p_ref, b_ref, g_ref,
                               beta_ref, o_ref):
    # w_ref   : (Cout, K)      conv weights, K = 9*Cin (im2col layout)
    # p_ref   : (K, M)         im2col patches, M = N*Ho*Wo (lane-dense)
    # b_ref   : (Cout, 1)      conv bias
    # g_ref   : (Cout, 1)      BN gamma
    # beta_ref: (Cout, 1)      BN beta
    # o_ref   : (Cout, M)      output (channels on sublanes, spatial on lanes)
    acc = jnp.dot(w_ref[...], p_ref[...],
                  preferred_element_type=jnp.float32)        # (Cout, M) on MXU
    acc = acc + b_ref[...]                                   # bias
    h = jnp.maximum(acc, 0.0)                                # ReLU

    # BatchNorm2d (training mode): per-channel mean / biased variance over
    # (N, Ho, Wo) == the lane axis here.
    mean = jnp.sum(h, axis=1, keepdims=True) * inv_m         # (Cout, 1)
    cent = h - mean
    var = jnp.sum(cent * cent, axis=1, keepdims=True) * inv_m
    inv = lax.rsqrt(var + eps)
    o_ref[...] = (cent * inv * g_ref[...] + beta_ref[...]).astype(o_ref.dtype)


def conv_stride_block_forward(x_nchw, w_oihw, bias, gamma, beta, stride,
                              eps=1e-5):
    N, Cin, Hin, Win = x_nchw.shape
    Cout = w_oihw.shape[0]
    Hp, Wp = Hin + 2, Win + 2                  # ZeroPad2d(1)
    Ho = (Hp - 3) // stride + 1                # conv 3x3, given stride, VALID
    Wo = (Wp - 3) // stride + 1
    K = 9 * Cin
    M = N * Ho * Wo

    # ---- plain-JAX glue: pad + im2col + weight flatten -----------------------
    xp = jnp.pad(x_nchw, ((0, 0), (0, 0), (1, 1), (1, 1)))
    cols = []
    for ky in range(3):
        for kx in range(3):
            cols.append(
                xp[:, :,
                   ky:ky + (Ho - 1) * stride + 1:stride,
                   kx:kx + (Wo - 1) * stride + 1:stride])    # (N, Cin, Ho, Wo)
    patches = jnp.stack(cols, axis=0)                        # (9, N, Cin, Ho, Wo)
    patches = jnp.transpose(patches, (2, 0, 1, 3, 4))        # (Cin, 9, N, Ho, Wo)
    patches = patches.reshape(K, M)                          # matches w flatten

    w_mat = w_oihw.reshape(Cout, K)                          # (Cin, ky, kx) order

    out = pl.pallas_call(
        functools.partial(_fused_conv_relu_bn_kernel, float(eps), 1.0 / M),
        out_shape=jax.ShapeDtypeStruct((Cout, M), jnp.float32),
        grid=(1,),
        in_specs=[
            pl.BlockSpec((Cout, K), lambda i: (0, 0)),
            pl.BlockSpec((K, M), lambda i: (0, 0)),
            pl.BlockSpec((Cout, 1), lambda i: (0, 0)),
            pl.BlockSpec((Cout, 1), lambda i: (0, 0)),
            pl.BlockSpec((Cout, 1), lambda i: (0, 0)),
        ],
        out_specs=pl.BlockSpec((Cout, M), lambda i: (0, 0)),
        compiler_params=pltpu.CompilerParams(
            dimension_semantics=("arbitrary",)),
    )(w_mat, patches, bias.reshape(Cout, 1), gamma.reshape(Cout, 1),
      beta.reshape(Cout, 1))

    # (Cout, N*Ho*Wo) -> PyTorch's NCHW.
    return jnp.transpose(out.reshape(Cout, N, Ho, Wo), (1, 0, 2, 3))


def conv_stride_block_reference(x, w, b, gamma, beta, stride, eps=1e-5):
    """Pure-JAX reference, same semantics as ConvStrideBlock.forward (train)."""
    xp = jnp.pad(x, ((0, 0), (0, 0), (1, 1), (1, 1)))
    conv = lax.conv_general_dilated(
        xp, w, (stride, stride), 'VALID',
        dimension_numbers=('NCHW', 'OIHW', 'NCHW'))
    conv = conv + b[None, :, None, None]
    h = jnp.maximum(conv, 0.0)
    mean = jnp.mean(h, axis=(0, 2, 3), keepdims=True)
    var = jnp.mean((h - mean) ** 2, axis=(0, 2, 3), keepdims=True)
    return ((h - mean) * lax.rsqrt(var + eps) * gamma[None, :, None, None]
            + beta[None, :, None, None])


if __name__ == "__main__":
    # Small shapes consistent with the module: batch=2, in_ch=4, out_ch=8,
    # spatial=16, stride=2.  Output spatial = (16+2-3)//2 + 1 = 8.
    N, Cin, Cout, S, STRIDE = 2, 4, 8, 16, 2

    key = jax.random.PRNGKey(0)
    kx, kw, kb, kg, kbeta = jax.random.split(key, 5)

    x = jax.random.normal(kx, (N, Cin, S, S), dtype=jnp.float32)

    # Deterministic parameter init (Conv2d-like uniform fan-in bound).
    bound = 1.0 / (Cin * 3 * 3) ** 0.5
    w = jax.random.uniform(kw, (Cout, Cin, 3, 3), jnp.float32, -bound, bound)
    b = jax.random.uniform(kb, (Cout,), jnp.float32, -bound, bound)
    gamma = 1.0 + 0.1 * jax.random.normal(kg, (Cout,), dtype=jnp.float32)
    beta = 0.1 * jax.random.normal(kbeta, (Cout,), dtype=jnp.float32)

    out = conv_stride_block_forward(x, w, b, gamma, beta, STRIDE)
    out = jax.block_until_ready(out)

    ref = jax.block_until_ready(
        conv_stride_block_reference(x, w, b, gamma, beta, STRIDE))
    Ho = (S + 2 - 3) // STRIDE + 1
    assert out.shape == (N, Cout, Ho, Ho), out.shape
    assert jnp.allclose(out, ref, rtol=1e-4, atol=1e-4), \
        float(jnp.max(jnp.abs(out - ref)))

    print("KERNEL_OK")
</pallas_src>

<mosaic_0001>
module attributes {stable_mosaic.version = 11 : i64} {
  func.func @_fused_conv_relu_bn_kernel(%arg0: i32, %arg1: memref<8x36xf32, #tpu.memory_space<vmem>>, %arg2: memref<36x128xf32, #tpu.memory_space<vmem>>, %arg3: memref<8x1xf32, #tpu.memory_space<vmem>>, %arg4: memref<8x1xf32, #tpu.memory_space<vmem>>, %arg5: memref<8x1xf32, #tpu.memory_space<vmem>>, %arg6: memref<8x128xf32, #tpu.memory_space<vmem>>) attributes {dimension_semantics = [#tpu.dimension_semantics<arbitrary>], iteration_bounds = array<i64: 1>, scalar_prefetch = 0 : i64, scratch_operands = 0 : i64, tpu.core_type = #tpu.core_type<tc>, window_params = [{pipeline_mode = #tpu.pipeline_mode<synchronous>, transform_indices = @transform_0, window_bounds = array<i64: 8, 36>}, {pipeline_mode = #tpu.pipeline_mode<synchronous>, transform_indices = @transform_1, window_bounds = array<i64: 36, 128>}, {pipeline_mode = #tpu.pipeline_mode<synchronous>, transform_indices = @transform_2, window_bounds = array<i64: 8, 1>}, {pipeline_mode = #tpu.pipeline_mode<synchronous>, transform_indices = @transform_3, window_bounds = array<i64: 8, 1>}, {pipeline_mode = #tpu.pipeline_mode<synchronous>, transform_indices = @transform_4, window_bounds = array<i64: 8, 1>}, {pipeline_mode = #tpu.pipeline_mode<synchronous>, transform_indices = @transform_5, window_bounds = array<i64: 8, 128>}]} {
    %c0 = arith.constant 0 : index
    %c0_0 = arith.constant 0 : index
    %0 = vector.load %arg1[%c0, %c0_0] : memref<8x36xf32, #tpu.memory_space<vmem>>, vector<8x36xf32>
    %c0_1 = arith.constant 0 : index
    %c0_2 = arith.constant 0 : index
    %1 = vector.load %arg2[%c0_1, %c0_2] : memref<36x128xf32, #tpu.memory_space<vmem>>, vector<36x128xf32>
    %cst = arith.constant dense<0.000000e+00> : vector<8x128xf32>
    %2 = tpu.matmul %0, %1, %cst {dimension_numbers = #tpu.dot_dimension_numbers<[1], [0], [0], [1], [0, 0, 1, 1], [], []>} : vector<8x36xf32>, vector<36x128xf32>, vector<8x128xf32> -> vector<8x128xf32>
    %c0_3 = arith.constant 0 : index
    %c0_4 = arith.constant 0 : index
    %3 = vector.load %arg3[%c0_3, %c0_4] : memref<8x1xf32, #tpu.memory_space<vmem>>, vector<8x1xf32>
    %4 = vector.broadcast %3 : vector<8x1xf32> to vector<8x128xf32>
    %5 = arith.addf %2, %4 : vector<8x128xf32>
    %cst_5 = arith.constant 0.000000e+00 : f32
    %6 = vector.broadcast %cst_5 : f32 to vector<8x128xf32>
    %7 = arith.maximumf %5, %6 : vector<8x128xf32>
    %cst_6 = arith.constant dense<0.000000e+00> : vector<8xf32>
    %8 = vector.multi_reduction <add>, %7, %cst_6 [1] : vector<8x128xf32> to vector<8xf32>
    %9 = vector.shape_cast %8 : vector<8xf32> to vector<8x1xf32>
    %cst_7 = arith.constant 7.812500e-03 : f32
    %10 = vector.broadcast %cst_7 : f32 to vector<8x1xf32>
    %11 = arith.mulf %9, %10 : vector<8x1xf32>
    %12 = vector.broadcast %11 : vector<8x1xf32> to vector<8x128xf32>
    %13 = arith.subf %7, %12 : vector<8x128xf32>
    %14 = arith.mulf %13, %13 : vector<8x128xf32>
    %cst_8 = arith.constant dense<0.000000e+00> : vector<8xf32>
    %15 = vector.multi_reduction <add>, %14, %cst_8 [1] : vector<8x128xf32> to vector<8xf32>
    %16 = vector.shape_cast %15 : vector<8xf32> to vector<8x1xf32>
    %cst_9 = arith.constant 7.812500e-03 : f32
    %17 = vector.broadcast %cst_9 : f32 to vector<8x1xf32>
    %18 = arith.mulf %16, %17 : vector<8x1xf32>
    %cst_10 = arith.constant 9.99999974E-6 : f32
    %19 = vector.broadcast %cst_10 : f32 to vector<8x1xf32>
    %20 = arith.addf %18, %19 : vector<8x1xf32>
    %21 = math.rsqrt %20 : vector<8x1xf32>
    %22 = vector.broadcast %21 : vector<8x1xf32> to vector<8x128xf32>
    %23 = arith.mulf %13, %22 : vector<8x128xf32>
    %c0_11 = arith.constant 0 : index
    %c0_12 = arith.constant 0 : index
    %24 = vector.load %arg4[%c0_11, %c0_12] : memref<8x1xf32, #tpu.memory_space<vmem>>, vector<8x1xf32>
    %25 = vector.broadcast %24 : vector<8x1xf32> to vector<8x128xf32>
    %26 = arith.mulf %23, %25 : vector<8x128xf32>
    %c0_13 = arith.constant 0 : index
    %c0_14 = arith.constant 0 : index
    %27 = vector.load %arg5[%c0_13, %c0_14] : memref<8x1xf32, #tpu.memory_space<vmem>>, vector<8x1xf32>
    %28 = vector.broadcast %27 : vector<8x1xf32> to vector<8x128xf32>
    %29 = arith.addf %26, %28 : vector<8x128xf32>
    %c0_15 = arith.constant 0 : index
    %c0_16 = arith.constant 0 : index
    %30 = vector.load %arg6[%c0_15, %c0_16] : memref<8x128xf32, #tpu.memory_space<vmem>>, vector<8x128xf32>
    tpu.vector_store %arg6[%c0_15, %c0_16], %29 {strides = array<i32>} : memref<8x128xf32, #tpu.memory_space<vmem>>, vector<8x128xf32>,
    return
  }
  func.func @transform_0(%arg0: i32) -> (i32, i32) {
    %c0_i32 = arith.constant 0 : i32
    %c0_i32_0 = arith.constant 0 : i32
    %c0_i32_1 = arith.constant 0 : i32
    return %c0_i32, %c0_i32_0 : i32, i32
  }
  func.func @transform_1(%arg0: i32) -> (i32, i32) {
    %c0_i32 = arith.constant 0 : i32
    %c0_i32_0 = arith.constant 0 : i32
    %c0_i32_1 = arith.constant 0 : i32
    return %c0_i32, %c0_i32_0 : i32, i32
  }
  func.func @transform_2(%arg0: i32) -> (i32, i32) {
    %c0_i32 = arith.constant 0 : i32
    %c0_i32_0 = arith.constant 0 : i32
    %c0_i32_1 = arith.constant 0 : i32
    return %c0_i32, %c0_i32_0 : i32, i32
  }
  func.func @transform_3(%arg0: i32) -> (i32, i32) {
    %c0_i32 = arith.constant 0 : i32
    %c0_i32_0 = arith.constant 0 : i32
    %c0_i32_1 = arith.constant 0 : i32
    return %c0_i32, %c0_i32_0 : i32, i32
  }
  func.func @transform_4(%arg0: i32) -> (i32, i32) {
    %c0_i32 = arith.constant 0 : i32
    %c0_i32_0 = arith.constant 0 : i32
    %c0_i32_1 = arith.constant 0 : i32
    return %c0_i32, %c0_i32_0 : i32, i32
  }
  func.func @transform_5(%arg0: i32) -> (i32, i32) {
    %c0_i32 = arith.constant 0 : i32
    %c0_i32_0 = arith.constant 0 : i32
    %c0_i32_1 = arith.constant 0 : i32
    return %c0_i32, %c0_i32_0 : i32, i32
  }
}

</mosaic_0001>

<bundles_post_ra>
// kernel: tpu_custom_call.1
= control target key start
LH: loop header
LB: loop body
LE: loop exit
PB: predicated region body
PF: predicated region fallthrough
CT: control target
= control target key end

     0   :  { %10 = vsyncpa [#allocation3], 0  ;;  %s247_s0 = inlined_call_operand.vmem [shape: f32[8,36], index: 0, kind: input, shape index: {}]   ;;  %s248_s1 = inlined_call_operand.hbm [shape: f32[36,128], index: 1, kind: input, shape index: {}]   ;;  %s249_s2 = inlined_call_operand.vmem [shape: f32[8,1], index: 2, kind: input, shape index: {}]   ;;  %s250_s3 = inlined_call_operand.vmem [shape: f32[8,1], index: 3, kind: input, shape index: {}]   ;;  %s251_s4 = inlined_call_operand.vmem [shape: f32[8,1], index: 4, kind: input, shape index: {}]   ;;  %s252_s5 = inlined_call_operand.hbm [shape: f32[8,128], index: 5, kind: output, shape index: {}]  }
   0x1   :  { %11 = vsyncpa [#allocation4], 0  ;;  %s18_s20 = sshll.u32 %s248_s1, 4  ;;  %s194_s21 = smov [#allocation2]   ;;  %s19_s20 = int_to_ptr.hbm [resolvable:$true] %s18_s20 }
   0x2   :  { %s20_s22 = sshll.u32 %s194_s21, 4  ;;  %s195_s23 = smov 128   ;;  %s21_s22 = int_to_ptr.vmem [resolvable:$true] %s20_s22 }
   0x3   :  { %s196_s24 = smov 8  }
   0x4   :  { %26 = dma.hbm_to_vmem [thread:$0]  %s19_s20, 640, %s21_s22, [#allocation3], %s195_s23, %s195_s23, %s196_s24  }
   0x5   :  { %190 = dma.done.wait [#allocation3], 640  }
   0x6   :  { %191 = vsyncadd [#allocation3], 4294966656  ;;  %v197_v0 = vmov 0   ;;  %vm53_vm0 = vcmask 1043456   ;;  %v42_v1 = vld [vmem:[#allocation2 + $0x20] sm:$0xf] }
   0x7   :  { %137 = vset.pattern.permute.xlu0 %v197_v0  ;;  %138 = vset.pattern.permute.xlu1 %v197_v0  ;;  %v41_v2 = vld [vmem:[#allocation2 + $0x18] sm:$0xff]  ;;  %v40_v3 = vld [vmem:[#allocation2 + $0x10] sm:$0xff]  ;;  %v43_v4 = vld [vmem:[%s249_s2] sm:$0xff]  ;;  %vm49_vm1 = vcmask 293888   ;;  %s120_s7 = sshll.u32 %s252_s5, 4  ;;  %s121_s7 = int_to_ptr.hbm [resolvable:$true] %s120_s7 }
   0x8   :  { %139 = vset.pattern.permute.xlu2 %v197_v0  ;;  %130 = vmatpush.msk.msra.mxu0 %vm53_vm0, %v42_v1  ;;  %v39_v5 = vld [vmem:[#allocation2 + $0x8] sm:$0xff]  ;;  %v38_v6 = vld [vmem:[#allocation2] sm:$0xff] }
   0x9   :  { %46 = vperm.xlu0 %137, %v43_v4   ;;  %v37_v7 = vld [vmem:[%s247_s0] sm:$0xff] }
   0xa   :  { %69 = vmatpush.msra.mxu0 %v41_v2  ;;  %v105_v13 = vld [vmem:[%s251_s4] sm:$0xff]  ;;  %s198_s4 = smov [#allocation5]  }
   0xb   :  { %108 = vperm.xlu2 %139, %v105_v13   ;;  %v98_v17 = vld [vmem:[%s250_s3] sm:$0xff]  ;;  %s118_s3 = sshll.u32 %s198_s4, 4  ;;  %s119_s3 = int_to_ptr.vmem [resolvable:$true] %s118_s3 }
   0xc   :  { %70 = vmatpush.msra.mxu0 %v40_v3 }
   0xe   :  { %71 = vmatpush.msra.mxu0 %v39_v5 }
  0x10   :  { %72 = vmatpush.msra.mxu0 %v38_v6 }
  0x11   :  { %131 = vmatmul.msk.f32.vlgmr.msra.gmra.mxu0 %vm49_vm1, %v37_v7 }
  0x65   :  { %v109_v30 = vpop.permute.xlu2 %108 }
  0x7b   :  { %v47_v8 = vpop.permute.xlu0 %46 }
  0x8e   :  { %v74_v9 = vpop.f32.mrf.mxu0 }
  0x8f   :  { %v75_v10 = vadd.f32 %v74_v9, %v47_v8 }
  0x91   :  { %v77_v11 = vmax.f32 %v75_v10, 0.0 }
  0x93   :  { %78 = vadd.xlane.f32.xlu0 %v77_v11 }
 0x106   :  { %v79_v12 = vpop.xlane.xlu0 %78 }
 0x107   :  { %v80_v14 = vmul.f32 0.0078125, %v79_v12 }
 0x109   :  { %v81_v15 = vsub.f32 %v77_v11, %v80_v14 }
 0x10b   :  { %v82_v16 = vmul.f32 %v81_v15, %v81_v15 }
 0x10d   :  { %83 = vadd.xlane.f32.xlu1 %v82_v16 }
 0x126   :  { %101 = vperm.xlu1 %138, %v98_v17  }
 0x180   :  { %v84_v18 = vpop.xlane.xlu1 %83 }
 0x181   :  { %v85_v19 = vmul.f32 0.0078125, %v84_v18 }
 0x183   :  { %v86_v20 = vadd.f32 1e-05, %v85_v19 }
 0x185   :  { %140 = vrsqrt.f32 %v86_v20  ;;  %vm93_vm3 = vweird.f32 %v86_v20 }
 0x18b   :  { %v141_v21 = vpop.eup %140 }
 0x18c   :  { %v88_v22 = vmul.f32 %v141_v21, %v86_v20  ;;  %vm94_vm2 = vweird.f32 %v141_v21 }
 0x18d   :  { %vm95_vm4 = vmor %vm93_vm3, %vm94_vm2 }
 0x18e   :  { %v89_v23 = vmul.f32 %v141_v21, %v88_v22 }
 0x190   :  { %v90_v24 = vmul.f32 0.5, %v89_v23 }
 0x192   :  { %v91_v25 = vsub.f32 1.5, %v90_v24 }
 0x194   :  { %v92_v26 = vmul.f32 %v141_v21, %v91_v25 }
 0x196   :  { %v96_v27 = vsel %vm95_vm4, %v141_v21, %v92_v26 }
 0x197   :  { %v97_v28 = vmul.f32 %v96_v27, %v81_v15 }
 0x198   :  { %v102_v29 = vpop.permute.xlu1 %101 }
 0x199   :  { %v104_v31 = vmul.f32 %v102_v29, %v97_v28 }
 0x19b   :  { %v111_v32 = vadd.f32 %v109_v30, %v104_v31 }
 0x19d   :  { %112 = vst [vmem:[#allocation5] sm:$0xff] %v111_v32 }
 0x19e   :  { %123 = dma.vmem_to_hbm [thread:$0]  %s119_s3, 128, %s121_s7, [#allocation4]  }
 0x19f   :  { %192 = dma.done.wait [#allocation4], 128  }
 0x1a0   :  { %193 = vsyncadd [#allocation4], 4294967168 }
 0x1a1   :  { %128 = vsyncpa [#allocation3], 1 }
 0x1a2   :  { %129 = vsyncpa [#allocation4], 1 }

</bundles_post_ra>
